<compile_context>
chip_gen: v7x
topology: tpu7x:2x2x1
jax: 0.10.0
libtpu: 0.0.40
codegen_flags: <defaults>
</compile_context>

<pallas_src>
import functools

import jax
import jax.numpy as jnp
import numpy as np
from jax import lax
from jax.experimental import pallas as pl
from jax.experimental.pallas import tpu as pltpu

_LANE = 128
_SUBLANE = 8


def _round_up(x, m):
    return (x + m - 1) // m * m


def _fold_bn(gamma, beta, mean, var, eps=1e-5):
    scale = gamma / jnp.sqrt(var + eps)
    bias = beta - mean * scale
    return scale, bias                                   # (C,), (C,)


def _dec_block_kernel(x_ref, w1_ref, w2_ref, o_ref, *, seq_len, pad, k,
                      cout_p, out_w, mm_dtype):
    """One batch element per grid step; everything lane-dense.

    x_ref : (1, Cin_p, Wx)        Wx = out_w + 4*pad; column i <-> position i-2*pad
                                  (zero-padded in the wrapper; last Cin_p-Cin
                                  channels: one "ones" channel + zeros)
    w1_ref: (K, 2*Cout_p, Cin_p)  [conv1*s1 ; center-tap 1x1*su] ; biases live in
                                  the ones-channel column of the center tap
    w2_ref: (K, Cout_p, Cout_p)   conv2*s2 per tap
    o_ref : (1, Cout_p, out_w)    column j <-> position j (out_w % 128 == 0)
    """
    x = x_ref[0]                                  # (Cin_p, Wx)
    h_w = out_w + 2 * pad                         # h-slab width; col i <-> pos i-pad

    # ---- conv1 (+ fused residual 1x1) as K accumulated per-tap matmuls ----
    acc1 = jnp.dot(w1_ref[0], x[:, 0:h_w], preferred_element_type=jnp.float32)
    for t in range(1, k):
        acc1 = acc1 + jnp.dot(w1_ref[t], x[:, t:t + h_w],
                              preferred_element_type=jnp.float32)

    h = jnp.clip(acc1[:cout_p], 0.0, 6.0)         # bn1 (folded) + relu6
    # residual branch (1x1 conv + bnU; bn2's bias also folded in here)
    res = acc1[cout_p:, pad:pad + out_w]          # (Cout_p, out_w)

    # conv2's zero padding: zero h outside true positions [0, seq_len).
    pos = lax.broadcasted_iota(jnp.int32, h.shape, 1) - pad
    h = jnp.where((pos >= 0) & (pos < seq_len), h, 0.0).astype(mm_dtype)

    # ---- conv2 as K accumulated per-tap matmuls --------------------------
    acc2 = jnp.dot(w2_ref[0], h[:, 0:out_w], preferred_element_type=jnp.float32)
    for t in range(1, k):
        acc2 = acc2 + jnp.dot(w2_ref[t], h[:, t:t + out_w],
                              preferred_element_type=jnp.float32)

    # ---- residual add + relu6 (f32 epilogue) -----------------------------
    o_ref[0] = jnp.clip(acc2 + res, 0.0, 6.0).astype(o_ref.dtype)


def resnet1d_basic_dec_block(x, params, *, matmul_dtype=jnp.bfloat16):
    """x: (B, Cin, L) float32 -> (B, Cout, L) float32.  stride=1, eval-mode BN."""
    B, Cin, L = x.shape
    w1, w2, wup = params["w1"], params["w2"], params["wup"]
    Cout, _, K = w1.shape
    pad = (K - 1) // 2                            # dilation=1

    s1, b1 = _fold_bn(params["g1"], params["be1"], params["m1"], params["v1"])
    s2, b2 = _fold_bn(params["g2"], params["be2"], params["m2"], params["v2"])
    su, bu = _fold_bn(params["gu"], params["beu"], params["mu"], params["vu"])

    out_w = _round_up(L, _LANE)                   # lane-dense output slab
    w_h = out_w + 2 * pad                         # h slab width
    w_x = out_w + 4 * pad                         # input slab width
    cin_p = _round_up(Cin + 1, _SUBLANE)          # +1 "ones" channel for biases
    cout_p = _round_up(Cout, _SUBLANE)

    # Input slab (B, Cin_p, Wx): column i <-> position i - 2*pad; the ones
    # channel is 1 exactly on valid positions so biases land only there.
    xa = jnp.concatenate([x, jnp.ones((B, 1, L), x.dtype)], axis=1)
    xa = jnp.pad(xa, ((0, 0), (0, cin_p - Cin - 1),
                      (2 * pad, w_x - 2 * pad - L)))
    xa = xa.astype(matmul_dtype)

    # Per-tap conv1 weights (bn1 scale folded), residual 1x1 (+ bnU scale)
    # stacked as extra rows at the center tap.  Biases in the ones column;
    # bn2's bias is folded into the residual rows (out = conv2+res+b2).
    w1s = jnp.transpose(w1 * s1[:, None, None], (2, 0, 1))       # (K,Cout,Cin)
    w1_all = jnp.zeros((K, 2 * cout_p, cin_p), jnp.float32)
    w1_all = w1_all.at[:, :Cout, :Cin].set(w1s)
    w1_all = w1_all.at[pad, :Cout, Cin].set(b1)
    w1_all = w1_all.at[pad, cout_p:cout_p + Cout, :Cin].set(wup * su[:, None])
    w1_all = w1_all.at[pad, cout_p:cout_p + Cout, Cin].set(bu + b2)
    w1_all = w1_all.astype(matmul_dtype)

    w2s = jnp.transpose(w2 * s2[:, None, None], (2, 0, 1))       # (K,Cout,Cout)
    w2_all = jnp.zeros((K, cout_p, cout_p), jnp.float32)
    w2_all = w2_all.at[:, :Cout, :Cout].set(w2s)
    w2_all = w2_all.astype(matmul_dtype)

    kernel = functools.partial(_dec_block_kernel, seq_len=L, pad=pad, k=K,
                               cout_p=cout_p, out_w=out_w, mm_dtype=matmul_dtype)

    itemsize = jnp.dtype(matmul_dtype).itemsize
    flops = 2 * B * K * (w_h * (2 * cout_p) * cin_p + out_w * cout_p * cout_p)
    bytes_accessed = (itemsize * (xa.size + w1_all.size + w2_all.size)
                      + 4 * B * cout_p * out_w)

    out = pl.pallas_call(
        kernel,
        grid=(B,),
        in_specs=[
            pl.BlockSpec((1, cin_p, w_x), lambda b: (b, 0, 0)),
            pl.BlockSpec((K, 2 * cout_p, cin_p), lambda b: (0, 0, 0)),
            pl.BlockSpec((K, cout_p, cout_p), lambda b: (0, 0, 0)),
        ],
        out_specs=pl.BlockSpec((1, cout_p, out_w), lambda b: (b, 0, 0)),
        out_shape=jax.ShapeDtypeStruct((B, cout_p, out_w), jnp.float32),
        compiler_params=pltpu.CompilerParams(
            dimension_semantics=("parallel",),          # 2 TCs on v7x
            vmem_limit_bytes=32 * 1024 * 1024),         # fits v7x's 64 MiB VMEM
        cost_estimate=pl.CostEstimate(flops=flops, transcendentals=0,
                                      bytes_accessed=bytes_accessed),
    )(xa, w1_all, w2_all)

    return out[:, :Cout, :L]


# ---------------------------------------------------------------------------
# Pure-JAX reference (mirrors the PyTorch forward, eval-mode BN)
# ---------------------------------------------------------------------------
def _conv1d_ref(x, w, pad):
    return jax.lax.conv_general_dilated(
        x, w, window_strides=(1,), padding=[(pad, pad)],
        dimension_numbers=("NCH", "OIH", "NCH"))


def reference_forward(x, params):
    s1, b1 = _fold_bn(params["g1"], params["be1"], params["m1"], params["v1"])
    s2, b2 = _fold_bn(params["g2"], params["be2"], params["m2"], params["v2"])
    su, bu = _fold_bn(params["gu"], params["beu"], params["mu"], params["vu"])

    h = _conv1d_ref(x, params["w1"], pad=1)
    h = h * s1[None, :, None] + b1[None, :, None]
    h = jnp.clip(h, 0.0, 6.0)
    y = _conv1d_ref(h, params["w2"], pad=1)
    y = y * s2[None, :, None] + b2[None, :, None]
    res = _conv1d_ref(x, params["wup"][:, :, None], pad=0)
    res = res * su[None, :, None] + bu[None, :, None]
    return jnp.clip(y + res, 0.0, 6.0)


if __name__ == "__main__":
    B, Cin, Cout, L, K = 2, 4, 8, 16, 3

    key = jax.random.PRNGKey(0)
    keys = jax.random.split(key, 16)
    params = {
        # conv weights (PyTorch layout: (out, in, k)), no bias (norm_before=True)
        "w1": jax.random.normal(keys[0], (Cout, Cin, K), jnp.float32) * 0.2,
        "w2": jax.random.normal(keys[1], (Cout, Cout, K), jnp.float32) * 0.2,
        "wup": jax.random.normal(keys[2], (Cout, Cin), jnp.float32) * 0.2,
        # bn1
        "g1": jax.random.uniform(keys[3], (Cout,), jnp.float32, 0.5, 1.5),
        "be1": jax.random.normal(keys[4], (Cout,), jnp.float32) * 0.1,
        "m1": jax.random.normal(keys[5], (Cout,), jnp.float32) * 0.1,
        "v1": jax.random.uniform(keys[6], (Cout,), jnp.float32, 0.5, 1.5),
        # bn2
        "g2": jax.random.uniform(keys[7], (Cout,), jnp.float32, 0.5, 1.5),
        "be2": jax.random.normal(keys[8], (Cout,), jnp.float32) * 0.1,
        "m2": jax.random.normal(keys[9], (Cout,), jnp.float32) * 0.1,
        "v2": jax.random.uniform(keys[10], (Cout,), jnp.float32, 0.5, 1.5),
        # upsample bn
        "gu": jax.random.uniform(keys[11], (Cout,), jnp.float32, 0.5, 1.5),
        "beu": jax.random.normal(keys[12], (Cout,), jnp.float32) * 0.1,
        "mu": jax.random.normal(keys[13], (Cout,), jnp.float32) * 0.1,
        "vu": jax.random.uniform(keys[14], (Cout,), jnp.float32, 0.5, 1.5),
    }

    x = jax.random.normal(keys[15], (B, Cin, L), jnp.float32)

    ref = reference_forward(x, params)

    # Strict numerical check with f32 MXU inputs.
    out_f32 = jax.block_until_ready(
        resnet1d_basic_dec_block(x, params, matmul_dtype=jnp.float32))
    np.testing.assert_allclose(np.asarray(out_f32), np.asarray(ref),
                               rtol=1e-4, atol=1e-4)

    # Default bf16 MXU path (the realistic-shape config); loose sanity check.
    out_bf16 = jax.block_until_ready(resnet1d_basic_dec_block(x, params))
    np.testing.assert_allclose(np.asarray(out_bf16), np.asarray(ref),
                               rtol=0.0, atol=0.25)

    print("KERNEL_OK")
</pallas_src>

<mosaic_0001>
module attributes {stable_mosaic.version = 11 : i64} {
  func.func @_dec_block_kernel(%arg0: i32, %arg1: memref<1x8x132xf32, #tpu.memory_space<vmem>>, %arg2: memref<3x16x8xf32, #tpu.memory_space<vmem>>, %arg3: memref<3x8x8xf32, #tpu.memory_space<vmem>>, %arg4: memref<1x8x128xf32, #tpu.memory_space<vmem>>) attributes {dimension_semantics = [#tpu.dimension_semantics<parallel>], iteration_bounds = array<i64: 2>, scalar_prefetch = 0 : i64, scratch_operands = 0 : i64, tpu.core_type = #tpu.core_type<tc>, window_params = [{transform_indices = @transform_0, window_bounds = array<i64: 1, 8, 132>}, {pipeline_mode = #tpu.pipeline_mode<synchronous>, transform_indices = @transform_1, window_bounds = array<i64: 3, 16, 8>}, {pipeline_mode = #tpu.pipeline_mode<synchronous>, transform_indices = @transform_2, window_bounds = array<i64: 3, 8, 8>}, {transform_indices = @transform_3, window_bounds = array<i64: 1, 8, 128>}]} {
    %c0 = arith.constant 0 : index
    %c0_0 = arith.constant 0 : index
    %c0_1 = arith.constant 0 : index
    %0 = vector.load %arg1[%c0, %c0_0, %c0_1] : memref<1x8x132xf32, #tpu.memory_space<vmem>>, vector<1x8x132xf32>
    %1 = vector.shape_cast %0 : vector<1x8x132xf32> to vector<8x132xf32>
    %c0_2 = arith.constant 0 : index
    %c0_3 = arith.constant 0 : index
    %c0_4 = arith.constant 0 : index
    %2 = vector.load %arg2[%c0_2, %c0_3, %c0_4] : memref<3x16x8xf32, #tpu.memory_space<vmem>>, vector<1x16x8xf32>
    %3 = vector.shape_cast %2 : vector<1x16x8xf32> to vector<16x8xf32>
    %4 = vector.extract_strided_slice %1 {offsets = [0, 0], sizes = [8, 130], strides = [1, 1]} : vector<8x132xf32> to vector<8x130xf32>
    %cst = arith.constant dense<0.000000e+00> : vector<16x130xf32>
    %5 = tpu.matmul %3, %4, %cst {dimension_numbers = #tpu.dot_dimension_numbers<[1], [0], [0], [1], [0, 0, 1, 1], [], []>} : vector<16x8xf32>, vector<8x130xf32>, vector<16x130xf32> -> vector<16x130xf32>
    %c1 = arith.constant 1 : index
    %c0_5 = arith.constant 0 : index
    %c0_6 = arith.constant 0 : index
    %6 = vector.load %arg2[%c1, %c0_5, %c0_6] : memref<3x16x8xf32, #tpu.memory_space<vmem>>, vector<1x16x8xf32>
    %7 = vector.shape_cast %6 : vector<1x16x8xf32> to vector<16x8xf32>
    %8 = vector.extract_strided_slice %1 {offsets = [0, 1], sizes = [8, 130], strides = [1, 1]} : vector<8x132xf32> to vector<8x130xf32>
    %cst_7 = arith.constant dense<0.000000e+00> : vector<16x130xf32>
    %9 = tpu.matmul %7, %8, %cst_7 {dimension_numbers = #tpu.dot_dimension_numbers<[1], [0], [0], [1], [0, 0, 1, 1], [], []>} : vector<16x8xf32>, vector<8x130xf32>, vector<16x130xf32> -> vector<16x130xf32>
    %10 = arith.addf %5, %9 : vector<16x130xf32>
    %c2 = arith.constant 2 : index
    %c0_8 = arith.constant 0 : index
    %c0_9 = arith.constant 0 : index
    %11 = vector.load %arg2[%c2, %c0_8, %c0_9] : memref<3x16x8xf32, #tpu.memory_space<vmem>>, vector<1x16x8xf32>
    %12 = vector.shape_cast %11 : vector<1x16x8xf32> to vector<16x8xf32>
    %13 = vector.extract_strided_slice %1 {offsets = [0, 2], sizes = [8, 130], strides = [1, 1]} : vector<8x132xf32> to vector<8x130xf32>
    %cst_10 = arith.constant dense<0.000000e+00> : vector<16x130xf32>
    %14 = tpu.matmul %12, %13, %cst_10 {dimension_numbers = #tpu.dot_dimension_numbers<[1], [0], [0], [1], [0, 0, 1, 1], [], []>} : vector<16x8xf32>, vector<8x130xf32>, vector<16x130xf32> -> vector<16x130xf32>
    %15 = arith.addf %10, %14 : vector<16x130xf32>
    %16 = vector.extract_strided_slice %15 {offsets = [0, 0], sizes = [8, 130], strides = [1, 1]} : vector<16x130xf32> to vector<8x130xf32>
    %cst_11 = arith.constant 0.000000e+00 : f32
    %cst_12 = arith.constant 6.000000e+00 : f32
    %17 = vector.broadcast %cst_11 : f32 to vector<8x130xf32>
    %18 = arith.maximumf %17, %16 : vector<8x130xf32>
    %19 = vector.broadcast %cst_12 : f32 to vector<8x130xf32>
    %20 = arith.minimumf %19, %18 : vector<8x130xf32>
    %21 = vector.extract_strided_slice %15 {offsets = [8, 1], sizes = [8, 128], strides = [1, 1]} : vector<16x130xf32> to vector<8x128xf32>
    %22 = tpu.iota {dimensions = array<i32: 1>} : vector<8x130xi32>
    %c1_i32 = arith.constant 1 : i32
    %23 = vector.broadcast %c1_i32 : i32 to vector<8x130xi32>
    %24 = arith.subi %22, %23 : vector<8x130xi32>
    %c0_i32 = arith.constant 0 : i32
    %25 = vector.broadcast %c0_i32 : i32 to vector<8x130xi32>
    %26 = arith.cmpi sge, %24, %25 : vector<8x130xi32>
    %c16_i32 = arith.constant 16 : i32
    %27 = vector.broadcast %c16_i32 : i32 to vector<8x130xi32>
    %28 = arith.cmpi slt, %24, %27 : vector<8x130xi32>
    %29 = arith.andi %26, %28 : vector<8x130xi1>
    %cst_13 = arith.constant 0.000000e+00 : f32
    %30 = vector.broadcast %cst_13 : f32 to vector<8x130xf32>
    %31 = arith.select %29, %20, %30 : vector<8x130xi1>, vector<8x130xf32>
    %c0_14 = arith.constant 0 : index
    %c0_15 = arith.constant 0 : index
    %c0_16 = arith.constant 0 : index
    %32 = vector.load %arg3[%c0_14, %c0_15, %c0_16] : memref<3x8x8xf32, #tpu.memory_space<vmem>>, vector<1x8x8xf32>
    %33 = vector.shape_cast %32 : vector<1x8x8xf32> to vector<8x8xf32>
    %34 = vector.extract_strided_slice %31 {offsets = [0, 0], sizes = [8, 128], strides = [1, 1]} : vector<8x130xf32> to vector<8x128xf32>
    %cst_17 = arith.constant dense<0.000000e+00> : vector<8x128xf32>
    %35 = tpu.matmul %33, %34, %cst_17 {dimension_numbers = #tpu.dot_dimension_numbers<[1], [0], [0], [1], [0, 0, 1, 1], [], []>} : vector<8x8xf32>, vector<8x128xf32>, vector<8x128xf32> -> vector<8x128xf32>
    %c1_18 = arith.constant 1 : index
    %c0_19 = arith.constant 0 : index
    %c0_20 = arith.constant 0 : index
    %36 = vector.load %arg3[%c1_18, %c0_19, %c0_20] : memref<3x8x8xf32, #tpu.memory_space<vmem>>, vector<1x8x8xf32>
    %37 = vector.shape_cast %36 : vector<1x8x8xf32> to vector<8x8xf32>
    %38 = vector.extract_strided_slice %31 {offsets = [0, 1], sizes = [8, 128], strides = [1, 1]} : vector<8x130xf32> to vector<8x128xf32>
    %cst_21 = arith.constant dense<0.000000e+00> : vector<8x128xf32>
    %39 = tpu.matmul %37, %38, %cst_21 {dimension_numbers = #tpu.dot_dimension_numbers<[1], [0], [0], [1], [0, 0, 1, 1], [], []>} : vector<8x8xf32>, vector<8x128xf32>, vector<8x128xf32> -> vector<8x128xf32>
    %40 = arith.addf %35, %39 : vector<8x128xf32>
    %c2_22 = arith.constant 2 : index
    %c0_23 = arith.constant 0 : index
    %c0_24 = arith.constant 0 : index
    %41 = vector.load %arg3[%c2_22, %c0_23, %c0_24] : memref<3x8x8xf32, #tpu.memory_space<vmem>>, vector<1x8x8xf32>
    %42 = vector.shape_cast %41 : vector<1x8x8xf32> to vector<8x8xf32>
    %43 = vector.extract_strided_slice %31 {offsets = [0, 2], sizes = [8, 128], strides = [1, 1]} : vector<8x130xf32> to vector<8x128xf32>
    %cst_25 = arith.constant dense<0.000000e+00> : vector<8x128xf32>
    %44 = tpu.matmul %42, %43, %cst_25 {dimension_numbers = #tpu.dot_dimension_numbers<[1], [0], [0], [1], [0, 0, 1, 1], [], []>} : vector<8x8xf32>, vector<8x128xf32>, vector<8x128xf32> -> vector<8x128xf32>
    %45 = arith.addf %40, %44 : vector<8x128xf32>
    %46 = arith.addf %45, %21 : vector<8x128xf32>
    %cst_26 = arith.constant 0.000000e+00 : f32
    %cst_27 = arith.constant 6.000000e+00 : f32
    %47 = vector.broadcast %cst_26 : f32 to vector<8x128xf32>
    %48 = arith.maximumf %47, %46 : vector<8x128xf32>
    %49 = vector.broadcast %cst_27 : f32 to vector<8x128xf32>
    %50 = arith.minimumf %49, %48 : vector<8x128xf32>
    %c0_28 = arith.constant 0 : index
    %c0_29 = arith.constant 0 : index
    %c0_30 = arith.constant 0 : index
    %51 = vector.load %arg4[%c0_28, %c0_29, %c0_30] : memref<1x8x128xf32, #tpu.memory_space<vmem>>, vector<1x8x128xf32>
    %52 = vector.shape_cast %51 : vector<1x8x128xf32> to vector<8x128xf32>
    %53 = vector.shape_cast %50 : vector<8x128xf32> to vector<1x8x128xf32>
    tpu.vector_store %arg4[%c0_28, %c0_29, %c0_30], %53 {strides = array<i32>} : memref<1x8x128xf32, #tpu.memory_space<vmem>>, vector<1x8x128xf32>,
    return
  }
  func.func @transform_0(%arg0: i32) -> (i32, i32, i32) {
    %c0_i32 = arith.constant 0 : i32
    %c0_i32_0 = arith.constant 0 : i32
    %c0_i32_1 = arith.constant 0 : i32
    return %arg0, %c0_i32, %c0_i32_0 : i32, i32, i32
  }
  func.func @transform_1(%arg0: i32) -> (i32, i32, i32) {
    %c0_i32 = arith.constant 0 : i32
    %c0_i32_0 = arith.constant 0 : i32
    %c0_i32_1 = arith.constant 0 : i32
    %c0_i32_2 = arith.constant 0 : i32
    return %c0_i32, %c0_i32_0, %c0_i32_1 : i32, i32, i32
  }
  func.func @transform_2(%arg0: i32) -> (i32, i32, i32) {
    %c0_i32 = arith.constant 0 : i32
    %c0_i32_0 = arith.constant 0 : i32
    %c0_i32_1 = arith.constant 0 : i32
    %c0_i32_2 = arith.constant 0 : i32
    return %c0_i32, %c0_i32_0, %c0_i32_1 : i32, i32, i32
  }
  func.func @transform_3(%arg0: i32) -> (i32, i32, i32) {
    %c0_i32 = arith.constant 0 : i32
    %c0_i32_0 = arith.constant 0 : i32
    %c0_i32_1 = arith.constant 0 : i32
    return %arg0, %c0_i32, %c0_i32_0 : i32, i32, i32
  }
}

</mosaic_0001>

<bundles_post_ra>
// kernel: tpu_custom_call.1
= control target key start
LH: loop header
LB: loop body
LE: loop exit
PB: predicated region body
PF: predicated region fallthrough
CT: control target
= control target key end

     0   :  { %8 = vsyncpa [#allocation3], 0  ;;  %s1158_s0 = inlined_call_operand.vmem [shape: f32[2,8,132], index: 0, kind: input, shape index: {}]   ;;  %s1159_s1 = inlined_call_operand.vmem [shape: f32[3,16,8], index: 1, kind: input, shape index: {}]   ;;  %s1160_s2 = inlined_call_operand.vmem [shape: f32[3,8,8], index: 2, kind: input, shape index: {}]   ;;  %s1161_s3 = inlined_call_operand.hbm [shape: f32[2,8,128], index: 3, kind: output, shape index: {}]  }
   0x1   :  { %10 = vsyncpa [#allocation3 + $0x1], 0  ;;  %s982_s12 = smov 0   ;;  %s984_s13 = smov 0  }
   0x2   :  { %s986_s14 = smov 0   ;;  %s988_s15 = smov 0  }
   0x3 LB: > { %s1003_s16 = sadd.s32 4294967295, %s955_s15   ;;  %s792_s17 = sadd.s32 4294967294, %s955_s15   ;;  %s955_s15 = sphi %s988_s15, %s1169_s15   ;;  %s951_s14 = sphi %s986_s14, %s1168_s14   ;;  %s947_s13 = sphi %s984_s13, %s1167_s13   ;;  %s943_s12 = sphi %s982_s12, %s1166_s12  }
   0x4   : > { %s1007_s18 = sadd.s32 1, %s955_s15   ;;  %s91_s19 = sadd.s32 1, %s951_s14 }
   0x5   : > { %s88_s20 = ssub.s32 %s955_s15, %s1007_s18  ;;  %p101_p0 = scmp.ne.s32.totalorder %s951_s14, %s947_s13 }
   0x6   : > { %p89_p1 = scmp.eq.s32.totalorder %s88_s20, 0  ;;  %p102_p2 = scmp.eq.s32.totalorder %s1003_s16, 1 }
   0x7   : > { %p107_p3 = scmp.ne.s32.totalorder %s947_s13, %s943_s12  ;;  %p108_p4 = scmp.eq.s32.totalorder %s792_s17, 1 }
   0x8   : > { %s1018_s21 = scalar_select %p89_p1, %s951_s14, %s91_s19  }
   0x9   : > { %p1020_p5 = por %p102_p2, %p101_p0  ;;  %p1024_p6 = por %p108_p4, %p107_p3 }
   0xa   : > { %p795_p7 = scmp.ge.s32.totalorder %s955_s15, 1  ;;  %p140_p8 = scmp.lt.s32.totalorder %s955_s15, 3 }
   0xc   : > { %p141_p9 = pnand %p795_p7, %p140_p8 }
   0xd   : > { %p164_p10 = scmp.lt.s32.totalorder (!%p141_p9), %s1003_s16, 1  ;;  %v957_v0 = vmov (!%p141_p9), 0.0   ;;  %s958_s29 = smov (!%p141_p9), 126   ;;  %v171_v3 = vld [vmem:[%s1159_s1] sm:$0xff] (!%p141_p9)  ;;  %vm186_vm0 = vcmask (!%p141_p9), 64512   ;;  %v172_v4 = vld [vmem:[%s1159_s1 + $0x8] sm:$0xff] (!%p141_p9)  ;;  %v455_v15 = vlaneseq (!%p141_p9) }
   0xe   : > { %144 = sbr.rel (%p141_p9) target bundleno = 725 (0x2d5), region = 32  ;;  %340 = vmatprep.mubr.f32.mxu0 (!%p141_p9), %v957_v0  ;;  %257 = vmatprep.mubr.f32.mxu1 (!%p141_p9), %v957_v0  ;;  %s959_s30 = smov (!%p141_p9), 127   ;;  %vm360_vm1 = vcmask (!%p141_p9), 1031168   ;;  %vm182_vm2 = vcmask (!%p141_p9), 1039360   ;;  %v799_v9 = vld [vmem:[%s1159_s1 + $0x10] sm:$0xff] (!%p141_p9)  ;;  %v805_v10 = vld [vmem:[%s1159_s1 + $0x20] sm:$0xff] (!%p141_p9) }
   0xf   : > { %v800_v13 = vld [vmem:[%s1159_s1 + $0x18] sm:$0xff] (!%p141_p9)  ;;  %v806_v14 = vld [vmem:[%s1159_s1 + $0x28] sm:$0xff] (!%p141_p9)  ;;  %v456_v16 = vand.u32 (!%p141_p9), 127, %v455_v15  ;;  %vm960_vm3 = vmmov (!%p141_p9), 0   ;;  %v468_v39 = vld [vmem:[%s1160_s2] sm:$0xff] (!%p141_p9)  ;;  %s161_s4 = sand.u32 (!%p141_p9), 1, %s947_s13  }
  0x10   : > { %v811_v35 = vld [vmem:[%s1160_s2 + $0x8] sm:$0xff] (!%p141_p9)  ;;  %v815_v41 = vld [vmem:[%s1160_s2 + $0x10] sm:$0xff] (!%p141_p9)  ;;  %s796_s5 = sshll.u32 (!%p141_p9), %s161_s4, 3  ;;  %s818_s6 = sshll.u32 (!%p141_p9), %s1003_s16, 7 }
  0x11   : > { %v809_v17 = vadd.s32 (!%p141_p9), 4294967295, %v456_v16  ;;  %s163_s7 = scalar_lea.vmem (!%p141_p9), [#allocation2], %s796_s5  ;;  %s1116_s11 = scalar_lea.hbm (!%p141_p9), %s1161_s3, %s818_s6 }
  0x12   : > { %s733_s8 = sshll.u32 (!%p141_p9), %s163_s7, 4  ;;  %s720_s17 = scalar_lea.sflag (!%p141_p9), [#allocation3], %s161_s4  ;;  %s1118_s8 = int_to_ptr.vmem [resolvable:$true] %s733_s8 }
  0x13   : > { %vm460_vm4 = vcmp.ge.s32.totalorder (!%p141_p9), %v809_v17, 0  ;;  %vm462_vm5 = vcmp.lt.s32.totalorder (!%p141_p9), %v809_v17, 16  ;;  %s893_s19 = scalar_lea.vmem (!%p141_p9), %s1118_s8, 128 }
  0x14   : > { %vm1078_vm6 = vmand (!%p141_p9), %vm460_vm4, %vm462_vm5  ;;  %p894_p11 = scmp.ne.s32.totalorder (!%p141_p9), %s1118_s8, %s893_s19 }
  0x15   : > { %s165_s24 = scalar_select %p164_p10, %s1003_s16, 1 }
  0x16   : > { %p895_p12 = pnand %p894_p11, %p1020_p5  ;;  %s961_s16 = smov [#allocation2]  }
  0x17   : > { %s821_s25 = sshll.u32 %s165_s24, 4  ;;  %s897_s20 = sshll.u32 %s961_s16, 4  ;;  %s898_s20 = int_to_ptr.vmem [resolvable:$false] %s897_s20 }
  0x18   : > { %s168_s28 = scalar_lea.vmem %s1158_s0, %s821_s25  ;;  %p896_p13 = pneg %p895_p12 }
  0x19   : > { %v169_v1 = vld [vmem:[%s168_s28] sm:$0xff]  ;;  %v170_v2 = vld [vmem:[%s168_s28 + $0x8] sm:$0xff]  ;;  %s899_s24 = scalar_lea.vmem %s898_s20, 256  ;;  %p900_p0 = scmp.lt.s32.totalorder %s1118_s8, %s898_s20 }
  0x1a   : > { %356 = vrot.lane.b32.xlu1 %v169_v1, %s958_s29  ;;  %178 = vrot.lane.b32.xlu0 %v169_v1, %s959_s30  ;;  %p901_p1 = scmp.lt.s32.totalorder %s899_s24, %s893_s19 }
  0x1b   : > { %276 = vmatprep.subr.mxu0 %v170_v2 }
  0x1c   : > { %277 = vmatpush1.msra.mxu0 %v169_v1  ;;  %p902_p2 = por %p901_p1, %p900_p0 }
  0x1d   : > { %803 = vmatmul.mubr.msk.f32.vlgmr.msra.gmra.mrb[0].mxu0 %vm186_vm0, %v171_v3 }
  0x1e   : > { %358 = vrot.lane.b32.xlu1 %v170_v2, %s958_s29  ;;  %180 = vrot.lane.b32.xlu0 %v170_v2, %s959_s30  ;;  %p903_p3 = pnand %p902_p2, %p896_p13 }
  0x1f   : > { %346 = vmatprep.mubr.f32.mxu0 %v957_v0 }
  0x21   : > { %804 = vmatmul.mubr.msk.f32.gmra.mrb[2].mxu0 %vm186_vm0, %v172_v4 }
  0x22   : > { %434 = vmatprep.mubr.f32.mxu0 %v957_v0  ;;  %475 = vrot.lane.b32.xlu1 %v957_v0, %s959_s30 }
  0x26   : > { %629 = vrot.lane.b32.xlu1 %v957_v0, %s958_s29 }
  0x8c   : > { %v357_v5 = vpop.permute.xlu1 %356  ;;  %v179_v6 = vpop.permute.xlu0 %178 }
  0x90   : > { %v359_v7 = vpop.permute.xlu1 %358  ;;  %v181_v8 = vpop.permute.xlu0 %180 }
  0x91   : > { %v361_v11 = vsel %vm360_vm1, %v357_v5, %v359_v7  ;;  %193 = vmatprep.subr.mxu1 %v181_v8  ;;  %370 = vmatprep.subr.mxu0 %v359_v7  ;;  %v183_v12 = vsel %vm182_vm2, %v179_v6, %v181_v8 }
  0x92   : > { %194 = vmatpush1.msra.mxu1 %v183_v12  ;;  %371 = vmatpush1.msra.mxu0 %v361_v11 }
  0x93   : > { %801 = vmatmul.mubr.msk.f32.vlgmr.msra.gmra.mrb[0].mxu1 %vm186_vm0, %v799_v9  ;;  %807 = vmatmul.mubr.msk.f32.vlgmr.msra.gmra.mrb[0].mxu0 %vm186_vm0, %v805_v10 }
  0x94   : > { %263 = vmatprep.mubr.f32.mxu1 %v957_v0  ;;  %440 = vmatprep.mubr.f32.mxu0 %v957_v0  ;;  %v476_v33 = vpop.permute.xlu1 %475 }
  0x95   : > { %828 = vmatprep.subr.mxu1 %v957_v0 }
  0x97   : > { %802 = vmatmul.mubr.msk.f32.gmra.mrb[2].mxu1 %vm186_vm0, %v800_v13  ;;  %808 = vmatmul.mubr.msk.f32.gmra.mrb[2].mxu0 %vm186_vm0, %v806_v14 }
  0x98   : > { %830 = vmatprep.mubr.msk.f32.mxu1 %vm960_vm3, %v957_v0  ;;  %v630_v37 = vpop.permute.xlu1 %629 }
 0x166   : > { %v259_v18 = vpop.f32.mrb[0].mxu1  ;;  %v436_v19 = vpop.f32.mrb[0].mxu0 }
 0x167   : > { %v843_v20 = vadd.f32 %v436_v19, %v259_v18  ;;  %v261_v21 = vpop.f32.mrb[1].mxu1  ;;  %v438_v22 = vpop.f32.mrb[1].mxu0 }
 0x169   : > { %v451_v23 = vmax.f32 %v843_v20, 0.0 }
 0x16a   : > { %v265_v24 = vpop.f32.mrb[2].mxu1  ;;  %v442_v25 = vpop.f32.mrb[2].mxu0 }
 0x16b   : > { %v453_v27 = vmin.f32 %v451_v23, 6.0  ;;  %v844_v28 = vadd.f32 %v442_v25, %v265_v24  ;;  %v267_v29 = vpop.f32.mrb[3].mxu1  ;;  %v444_v30 = vpop.f32.mrb[3].mxu0 }
 0x16c   : > { %v845_v31 = vadd.f32 %v444_v30, %v267_v29 }
 0x16d   : > { %v466_v32 = vsel %vm1078_vm6, %v453_v27, 0.0 }
 0x16e   : > { %473 = vrot.lane.b32.xlu0 %v466_v32, %s959_s30  ;;  %711 = vrot.lane.b32.xlu1 %v845_v31, %s959_s30 }
 0x172   : > { %627 = vrot.lane.b32.xlu0 %v466_v32, %s958_s29 }
 0x176   : > { %709 = vrot.lane.b32.xlu0 %v844_v28, %s959_s30 }
 0x1e0   : > { %v474_v34 = vpop.permute.xlu0 %473  ;;  %v712_v49 = vpop.permute.xlu1 %711 }
 0x1e1   : > { %v477_v36 = vsel %vm182_vm2, %v474_v34, %v476_v33 }
 0x1e2   : > { %829 = vmatpush3.msra.mxu1 %v477_v36 }
 0x1e3   : > { %831 = vmatmul.mubr.msk.f32.vlgmr.msra.gmra.mrb[4].mxu1 %vm186_vm0, %v811_v35  ;;  %833 = vmatprep.subr.mxu1 %v957_v0 }
 0x1e4   : > { %834 = vmatpush3.msk.msra.mxu1 %vm1078_vm6, %v453_v27  ;;  %v628_v38 = vpop.permute.xlu0 %627  ;;  %835 = vmatprep.mubr.msk.f32.mxu1 %vm960_vm3, %v957_v0 }
 0x1e5   : > { %v631_v40 = vsel %vm360_vm1, %v628_v38, %v630_v37  ;;  %838 = vmatprep.subr.mxu1 %v957_v0 }
 0x1e7   : > { %836 = vmatmul.mubr.msk.f32.vlgmr.msra.gmra.mrb[6].mxu1 %vm186_vm0, %v468_v39 }
 0x1e8   : > { %839 = vmatpush3.msra.mxu1 %v631_v40  ;;  %840 = vmatprep.mubr.msk.f32.mxu1 %vm960_vm3, %v957_v0  ;;  %v710_v47 = vpop.permute.xlu0 %709 }
 0x1e9   : > { %v713_v52 = vsel %vm182_vm2, %v710_v47, %v712_v49 }
 0x1eb   : > { %841 = vmatmul.mubr.msk.f32.vlgmr.msra.gmra.mrb[8].mxu1 %vm186_vm0, %v815_v41 }
 0x2b6   : > { %v548_v42 = vpop.f32.mrb[4].mxu1 }
 0x2b7   : > { %v832_v43 = vpop.f32.mrb[5].mxu1 }
 0x2ba   : > { %v621_v44 = vpop.f32.mrb[6].mxu1 }
 0x2bb   : > { %v622_v45 = vadd.f32 %v621_v44, %v548_v42  ;;  %v837_v46 = vpop.f32.mrb[7].mxu1 }
 0x2be   : > { %v702_v48 = vpop.f32.mrb[8].mxu1 }
 0x2bf   : > { %v706_v50 = vadd.f32 %v702_v48, %v622_v45  ;;  %v842_v51 = vpop.f32.mrb[9].mxu1 }
 0x2c1   : > { %v715_v53 = vadd.f32 %v713_v52, %v706_v50 }
 0x2c3   : > { %v716_v54 = vmax.f32 %v715_v53, 0.0 }
 0x2c5   : > { %v717_v55 = vmin.f32 %v716_v54, 6.0 }
 0x2c7   : > { %718 = vst [vmem:[%s163_s7] sm:$0xff] %v717_v55 }
 0x2c8   : > { %906 = shalt.err (!%p903_p3)
}
 0x2c9   : > { %s907_s25 = scalar_lea.hbm %s1116_s11, 128  ;;  %s911_s28 = scalar_lea.hbm %s1161_s3, 256 }
 0x2ca   : > { %p908_p4 = scmp.ne.s32.totalorder %s1116_s11, %s907_s25  ;;  %p912_p9 = scmp.lt.u32.totalorder %s1116_s11, %s1161_s3 }
 0x2cb   : > { %p913_p10 = scmp.lt.u32.totalorder %s911_s28, %s907_s25  ;;  %p915_p12 = scmp.lt.u32.totalorder %s907_s25, %s1116_s11 }
 0x2cc   : > { %p909_p7 = pnand %p908_p4, %p1020_p5 }
 0x2cd   : > { %p914_p11 = por %p913_p10, %p912_p9 }
 0x2ce   : > { %p910_p8 = pneg %p909_p7 }
 0x2cf   : > { %p916_p13 = por %p915_p12, %p914_p11 }
 0x2d1   : > { %p917_p0 = pnand %p916_p13, %p910_p8 }
 0x2d3   : > { %920 = shalt.err (!%p917_p0)
}
 0x2d4   : > { %850 = dma.vmem_to_hbm [thread:$0]  (%p1020_p5), %s1118_s8, 128, %s1116_s11, %s720_s17  }
 0x2d5 PF: > { %p856_p1 = scmp.ge.s32.totalorder %s955_s15, 2  ;;  %s745_s4 = sand.u32 1, %s943_s12  }
 0x2d6   : > { %s746_s5 = scalar_lea.sflag [#allocation3], %s745_s4 }
 0x2d7   : > { %p853_p2 = pnand %p856_p1, %p1024_p6 }
 0x2d9   : > { %938 = dma.done.wait (!%p853_p2), %s746_s5, 128  }
 0x2da   : > { %940 = vsyncadd (!%p853_p2), %s746_s5, 4294967168  ;;  %p13_p3 = scmp.ge.s32.totalorder %s1007_s18, 4   ;;  %s1166_s12 = smov %s947_s13 }
 0x2db   : > { %s1167_s13 = smov %s951_s14  ;;  %s1168_s14 = smov %s1018_s21 }
 0x2dc   : > { %s1169_s15 = smov %s1007_s18  ;;  %15 = sbr.rel (!%p13_p3) target bundleno = 3 (0x3), region = 71 }
 0x2e3   :  { %751 = vsyncpa [#allocation3], 1 }
 0x2e4   :  { %753 = vsyncpa [#allocation3 + $0x1], 1 }

</bundles_post_ra>
